<compile_context>
chip_gen: v5e
topology: v5e:2x2
jax: 0.10.0
libtpu: 0.0.40
codegen_flags: <defaults>
</compile_context>

<pallas_src>
import jax
import jax.numpy as jnp
import numpy as np
from jax.experimental import pallas as pl
from jax.experimental.pallas import tpu as pltpu  # noqa: F401  (kept for parity with other kernels)


def identity(x):
    """Identity forward pass (recommended path).

    Returning x directly lets XLA remove the op entirely: no custom-call
    launch overhead, no fusion barrier, no copies on any TPU generation.
    """
    return x


def _identity_alias_kernel(x_hbm_ref, o_hbm_ref):
    # Output buffer *is* the input buffer (input_output_aliases={0: 0}):
    # there is nothing to load, compute, or store.
    del x_hbm_ref, o_hbm_ref


def identity_pallas(x):
    """Pallas identity (only if a custom-call boundary is required).

    Zero VMEM, zero grid, zero DMA.  0 HBM bytes moved when the caller
    donates x; otherwise XLA inserts a single defensive buffer copy.
    """
    return pl.pallas_call(
        _identity_alias_kernel,
        out_shape=jax.ShapeDtypeStruct(x.shape, x.dtype),
        # Leave both operands in place (HBM): no auto-DMA, no VMEM buffers.
        in_specs=[pl.BlockSpec(memory_space=pl.ANY)],
        out_specs=pl.BlockSpec(memory_space=pl.ANY),
        # Output 0 shares the buffer of input 0 -> nothing to copy in-kernel.
        input_output_aliases={0: 0},
    )(x)


if __name__ == "__main__":
    key = jax.random.PRNGKey(0)
    # Shape consistent with a small ResNet backbone feature map fed to the
    # (replaced) fc slot.
    x = jax.random.normal(key, (2, 4, 16, 16), dtype=jnp.float32)

    # Host-side reference captured before the calls (robust even if a caller
    # later donates the input buffer).
    x_host = np.asarray(x)

    # Recommended path: plain return (XLA elides it).
    y_fast = identity(x)
    jax.block_until_ready(y_fast)
    assert y_fast.shape == x_host.shape and y_fast.dtype == x_host.dtype
    assert np.array_equal(np.asarray(y_fast), x_host), "identity (fast path) mismatch"

    # Pallas path: exercise the kernel once.
    y = identity_pallas(x)
    jax.block_until_ready(y)
    assert y.shape == x_host.shape, (y.shape, x_host.shape)
    assert y.dtype == x_host.dtype, (y.dtype, x_host.dtype)
    assert np.array_equal(np.asarray(y), x_host), "identity (pallas path) mismatch"

    # Dtype-agnostic (nothing is tiled, so no (8,128)/packing constraints).
    xi = jnp.arange(2 * 4 * 16 * 16, dtype=jnp.int8).reshape(2, 4, 16, 16)
    xi_host = np.asarray(xi)
    yi = identity_pallas(xi)
    jax.block_until_ready(yi)
    assert yi.shape == xi_host.shape and yi.dtype == xi_host.dtype
    assert np.array_equal(np.asarray(yi), xi_host), "int8 identity mismatch"

    print("KERNEL_OK")
</pallas_src>

<mosaic_0001>
module attributes {stable_mosaic.version = 11 : i64} {
  func.func @_identity_alias_kernel(%arg0: memref<2x4x16x16xf32, #tpu.memory_space<any>>, %arg1: memref<2x4x16x16xf32, #tpu.memory_space<any>>) attributes {dimension_semantics = [], scalar_prefetch = 0 : i64, scratch_operands = 0 : i64, tpu.core_type = #tpu.core_type<tc>} {
    return
  }
}

</mosaic_0001>

<bundles_post_ra>
// kernel: tpu_custom_call.1
= control target key start
LH: loop header
LB: loop body
LE: loop exit
PB: predicated region body
PF: predicated region fallthrough
CT: control target
= control target key end

     0   :  { %s16_s0 = inlined_call_operand.hbm [shape: f32[2,4,16,16], index: 0, kind: input, shape index: {}, may-alias: {0,1}]   ;;  %s17_s1 = inlined_call_operand.hbm [shape: f32[2,4,16,16], index: 1, kind: output, shape index: {}, may-alias: {0,1}]  }

</bundles_post_ra>
